<compile_context>
chip_gen: v5e
topology: v5e:2x2
jax: 0.10.0
libtpu: 0.0.40
codegen_flags: <defaults>
</compile_context>

<pallas_src>
import functools

import jax
import jax.numpy as jnp
from jax.experimental import pallas as pl


S_LOGITS = 80            # fixed by nn.Linear((d_l+1)*d_u, 80)
S_PAD = 128              # lane-dense padded attention width (logits/softmax)
NEG_BIG = jnp.float32(-1e30)

# MXU-operand dtype (weights / encoder outputs / activations feeding dots).
MXU_DTYPE = jnp.bfloat16
_TOL = 2e-2 if MXU_DTYPE == jnp.bfloat16 else 1e-5


def attention_kernel(hflat_ref, word_ref, E_ref,
                     w1h_ref, w1w_ref, b1_ref,
                     w2a_ref, w2b_ref, b2_ref, alpha_ref,
                     out_ref, *, B, T):
    # All T timesteps fused into the matmul M dimension (M = B*T).  Rows are
    # batch-major (index = b*T + t) so the (B*T, S) -> (B, T, S) reshape for
    # the bvm is a free leading-dim split (no in-kernel transpose).
    hflat = hflat_ref[...]                  # (B*T, d_l*d_u)   MXU_DTYPE
    word = word_ref[...]                    # (B*T, d_u)       MXU_DTYPE

    # linear_l1du_inputlen with the torch concat folded into split weights:
    #   concat(h[0..d_l-1], word) @ W1.T == hflat @ w1h + word @ w1w
    logits = (jnp.dot(hflat, w1h_ref[...], preferred_element_type=jnp.float32)
              + jnp.dot(word, w1w_ref[...], preferred_element_type=jnp.float32)
              + b1_ref[...])                # (B*T, S_PAD) f32; padded lanes ~ -1e30

    # Softmax over the (padded) sequence axis; padded lanes -> exp(...) == 0
    # exactly, because the padded weight columns are exactly zero and the -1e30
    # bias is added in f32 after the f32-accumulated matmul.
    m = jnp.max(logits, axis=-1, keepdims=True)
    e = jnp.exp(logits - m)
    w = e / jnp.sum(e, axis=-1, keepdims=True)      # exact divide

    # bvm, T-fused:  f[b, t, d] = sum_s w[b, t, s] * E[b, s, d]
    w_bt = w.reshape(B, T, S_PAD).astype(MXU_DTYPE)
    f = jnp.einsum("bts,bsd->btd", w_bt, E_ref[...],
                   preferred_element_type=jnp.float32)        # (B, T, d_u) f32
    f = f.reshape(B * T, -1)                                   # (B*T, d_u)

    # linear_2du_du on concat(word, f):  c @ W2.T == word @ w2a + f @ w2b
    z = (jnp.dot(word, w2a_ref[...], preferred_element_type=jnp.float32)
         + jnp.dot(f.astype(MXU_DTYPE), w2b_ref[...],
                   preferred_element_type=jnp.float32)
         + b2_ref[...])                                        # (B*T, d_u) f32

    # PReLU (module declares num_parameters=d_l; broadcast over (.., d_u)
    # requires d_l == d_u or d_l == 1 -- inherited from the PyTorch code).
    alpha = alpha_ref[...]
    out_ref[...] = jnp.where(z >= 0.0, z, alpha * z)


def _prep_params(params, d_l, d_u):
    """Split/pad torch-layout weights for the kernel (done once per call)."""
    DL = d_l * d_u
    w1_t = params["w1"].T.astype(jnp.float32)                  # ((d_l+1)*d_u, 80)
    w1h = jnp.zeros((DL, S_PAD), jnp.float32).at[:, :S_LOGITS].set(w1_t[:DL])
    w1w = jnp.zeros((d_u, S_PAD), jnp.float32).at[:, :S_LOGITS].set(w1_t[DL:])
    # Padded logit lanes get a huge negative f32 bias -> softmax weight exactly
    # 0 (the padded weight columns are exactly zero, also exact in bf16).
    b1 = jnp.full((1, S_PAD), NEG_BIG, jnp.float32).at[0, :S_LOGITS].set(
        params["b1"].astype(jnp.float32))
    w2_t = params["w2"].T.astype(jnp.float32)                  # (2*d_u, d_u)
    w2a, w2b = w2_t[:d_u], w2_t[d_u:]                          # word-half / f-half
    b2 = params["b2"].reshape(1, d_u).astype(jnp.float32)
    alpha = params["alpha"].reshape(1, d_u).astype(jnp.float32)
    return (w1h.astype(MXU_DTYPE), w1w.astype(MXU_DTYPE), b1,
            w2a.astype(MXU_DTYPE), w2b.astype(MXU_DTYPE), b2, alpha)


@jax.jit
def attention_forward_fused(h_seq, word_seq, E, params):
    """T fused attention steps in ONE gridless pallas_call.

    h_seq:    (T, d_l, B, d_u)   decoder hidden-state stack per step
    word_seq: (T, B, d_u)        word embedding per step
    E:        (S=80, B, d_u)     encoder outputs (shared across steps)
    returns:  (T, B, d_u)
    """
    T, d_l, B, d_u = h_seq.shape
    S = E.shape[0]
    DL = d_l * d_u

    # One-time layout glue (tiny, amortised over all T steps).  Batch-major
    # rows: hflat_bt[b*T + t, l*d_u + d] = h_seq[t, l, b, d].
    hflat_bt = jnp.transpose(h_seq, (2, 0, 1, 3)).reshape(B * T, DL)
    word_bt = jnp.transpose(word_seq, (1, 0, 2)).reshape(B * T, d_u)
    E_b = jnp.zeros((B, S_PAD, d_u), jnp.float32).at[:, :S, :].set(
        jnp.transpose(E, (1, 0, 2)))
    w1h, w1w, b1, w2a, w2b, b2, alpha = _prep_params(params, d_l, d_u)

    out_bt = pl.pallas_call(
        functools.partial(attention_kernel, B=B, T=T),
        out_shape=jax.ShapeDtypeStruct((B * T, d_u), jnp.float32),
    )(hflat_bt.astype(MXU_DTYPE), word_bt.astype(MXU_DTYPE),
      E_b.astype(MXU_DTYPE), w1h, w1w, b1, w2a, w2b, b2, alpha)

    # (B*T, d_u) batch-major  ->  (T, B, d_u)
    return jnp.transpose(out_bt.reshape(B, T, d_u), (1, 0, 2))


def attention_forward(h, word, E, params):
    """Single-step Attention.forward (exact module signature). Returns (1, B, d_u)."""
    return attention_forward_fused(h[None], word, E, params)


def attention_reference(h, word, E, params):
    """Pure-JAX f32 reference mirroring the PyTorch forward, for verification."""
    d_l, B, d_u = h.shape
    i = jnp.transpose(h, (1, 0, 2)).reshape(B, d_l * d_u)
    a = jnp.concatenate([i, word[0]], axis=-1)
    logits = a @ params["w1"].T + params["b1"]
    w = jax.nn.softmax(logits, axis=1)
    f = jnp.einsum("bs,sbh->bh", w, E)
    c = jnp.concatenate([word[0], f], axis=-1)
    z = c @ params["w2"].T + params["b2"]
    alpha = params["alpha"]
    return jnp.where(z >= 0.0, z, alpha[None, :] * z)[None]


if __name__ == "__main__":
    # Small shapes consistent with the module; PReLU broadcast needs d_l == d_u.
    d_l = 16
    d_u = 16
    B = 2
    T = 8                      # decode timesteps fused into one pallas_call
    S = S_LOGITS               # 80, fixed by Linear((d_l+1)*d_u, 80)
    in1 = (d_l + 1) * d_u
    in2 = 2 * d_u

    key = jax.random.PRNGKey(0)
    k = jax.random.split(key, 8)

    h_seq = jax.random.normal(k[0], (T, d_l, B, d_u), jnp.float32)
    word_seq = jax.random.normal(k[1], (T, B, d_u), jnp.float32)
    E = jax.random.normal(k[2], (S, B, d_u), jnp.float32)

    lim1 = float(1.0 / jnp.sqrt(in1))
    lim2 = float(1.0 / jnp.sqrt(in2))
    params = {
        # torch.nn.Linear stores weight as (out, in); init ~ U(-1/sqrt(fan_in), .)
        "w1": jax.random.uniform(k[3], (S, in1), jnp.float32, -lim1, lim1),
        "b1": jax.random.uniform(k[4], (S,), jnp.float32, -lim1, lim1),
        "w2": jax.random.uniform(k[5], (d_u, in2), jnp.float32, -lim2, lim2),
        "b2": jax.random.uniform(k[6], (d_u,), jnp.float32, -lim2, lim2),
        # PReLU default init = 0.25 per channel
        "alpha": jnp.full((d_u,), 0.25, jnp.float32),
    }

    # Fused T-step kernel: one gridless pallas_call, one store.
    out = jax.block_until_ready(attention_forward_fused(h_seq, word_seq, E, params))
    assert out.shape == (T, B, d_u)

    # Per-step pure-JAX f32 reference mirroring the PyTorch forward.
    ref = jnp.stack(
        [attention_reference(h_seq[t], word_seq[t][None], E, params)[0]
         for t in range(T)], axis=0)
    # Tolerance is set by the bf16 MXU-operand cast (f32 accumulation); with
    # MXU_DTYPE = float32 the kernel matches the reference to ~1e-6.
    assert jnp.allclose(out, ref, atol=_TOL, rtol=_TOL), "mismatch vs reference"

    # Single-step path exactly matching the module signature: (1, B, d_u).
    out1 = jax.block_until_ready(
        attention_forward(h_seq[0], word_seq[0][None], E, params))
    assert out1.shape == (1, B, d_u)
    assert jnp.allclose(out1, ref[0][None], atol=_TOL, rtol=_TOL)

    print("KERNEL_OK")
</pallas_src>

<mosaic_0001>
module attributes {stable_mosaic.version = 11 : i64} {
  func.func @attention_kernel(%arg0: memref<16x256xbf16, #tpu.memory_space<vmem>>, %arg1: memref<16x16xbf16, #tpu.memory_space<vmem>>, %arg2: memref<2x128x16xbf16, #tpu.memory_space<vmem>>, %arg3: memref<256x128xbf16, #tpu.memory_space<vmem>>, %arg4: memref<16x128xbf16, #tpu.memory_space<vmem>>, %arg5: memref<1x128xf32, #tpu.memory_space<vmem>>, %arg6: memref<16x16xbf16, #tpu.memory_space<vmem>>, %arg7: memref<16x16xbf16, #tpu.memory_space<vmem>>, %arg8: memref<1x16xf32, #tpu.memory_space<vmem>>, %arg9: memref<1x16xf32, #tpu.memory_space<vmem>>, %arg10: memref<16x16xf32, #tpu.memory_space<vmem>>) attributes {dimension_semantics = [], scalar_prefetch = 0 : i64, scratch_operands = 0 : i64, tpu.core_type = #tpu.core_type<tc>} {
    %c0 = arith.constant 0 : index
    %c0_0 = arith.constant 0 : index
    %0 = vector.load %arg0[%c0, %c0_0] : memref<16x256xbf16, #tpu.memory_space<vmem>>, vector<16x256xbf16>
    %c0_1 = arith.constant 0 : index
    %c0_2 = arith.constant 0 : index
    %1 = vector.load %arg1[%c0_1, %c0_2] : memref<16x16xbf16, #tpu.memory_space<vmem>>, vector<16x16xbf16>
    %c0_3 = arith.constant 0 : index
    %c0_4 = arith.constant 0 : index
    %2 = vector.load %arg3[%c0_3, %c0_4] : memref<256x128xbf16, #tpu.memory_space<vmem>>, vector<256x128xbf16>
    %cst = arith.constant dense<0.000000e+00> : vector<16x128xf32>
    %3 = tpu.matmul %0, %2, %cst {dimension_numbers = #tpu.dot_dimension_numbers<[1], [0], [0], [1], [0, 0, 1, 1], [], []>} : vector<16x256xbf16>, vector<256x128xbf16>, vector<16x128xf32> -> vector<16x128xf32>
    %c0_5 = arith.constant 0 : index
    %c0_6 = arith.constant 0 : index
    %4 = vector.load %arg4[%c0_5, %c0_6] : memref<16x128xbf16, #tpu.memory_space<vmem>>, vector<16x128xbf16>
    %cst_7 = arith.constant dense<0.000000e+00> : vector<16x128xf32>
    %5 = tpu.matmul %1, %4, %cst_7 {dimension_numbers = #tpu.dot_dimension_numbers<[1], [0], [0], [1], [0, 0, 1, 1], [], []>} : vector<16x16xbf16>, vector<16x128xbf16>, vector<16x128xf32> -> vector<16x128xf32>
    %6 = arith.addf %3, %5 : vector<16x128xf32>
    %c0_8 = arith.constant 0 : index
    %c0_9 = arith.constant 0 : index
    %7 = vector.load %arg5[%c0_8, %c0_9] : memref<1x128xf32, #tpu.memory_space<vmem>>, vector<1x128xf32>
    %8 = vector.broadcast %7 : vector<1x128xf32> to vector<16x128xf32>
    %9 = arith.addf %6, %8 : vector<16x128xf32>
    %cst_10 = arith.constant dense<0xFF800000> : vector<16xf32>
    %10 = vector.multi_reduction <maximumf>, %9, %cst_10 [1] : vector<16x128xf32> to vector<16xf32>
    %11 = vector.shape_cast %10 : vector<16xf32> to vector<16x1xf32>
    %12 = vector.broadcast %11 : vector<16x1xf32> to vector<16x128xf32>
    %13 = arith.subf %9, %12 : vector<16x128xf32>
    %14 = math.exp %13 : vector<16x128xf32>
    %cst_11 = arith.constant dense<0.000000e+00> : vector<16xf32>
    %15 = vector.multi_reduction <add>, %14, %cst_11 [1] : vector<16x128xf32> to vector<16xf32>
    %16 = vector.shape_cast %15 : vector<16xf32> to vector<16x1xf32>
    %17 = vector.broadcast %16 : vector<16x1xf32> to vector<16x128xf32>
    %18 = arith.divf %14, %17 : vector<16x128xf32>
    %19 = vector.shape_cast %18 : vector<16x128xf32> to vector<2x8x128xf32>
    %20 = arith.truncf %19 : vector<2x8x128xf32> to vector<2x8x128xbf16>
    %c0_12 = arith.constant 0 : index
    %c0_13 = arith.constant 0 : index
    %c0_14 = arith.constant 0 : index
    %21 = vector.load %arg2[%c0_12, %c0_13, %c0_14] : memref<2x128x16xbf16, #tpu.memory_space<vmem>>, vector<2x128x16xbf16>
    "tpu.trace_start"() <{level = 10 : i32, message = "bts,bsd->btd"}> : () -> ()
    %cst_15 = arith.constant dense<0.000000e+00> : vector<2x8x16xf32>
    %22 = tpu.matmul %20, %21, %cst_15 {dimension_numbers = #tpu.dot_dimension_numbers<[2], [1], [1], [2], [0, 0, 0, 1, 1, 2], [0], [0]>} : vector<2x8x128xbf16>, vector<2x128x16xbf16>, vector<2x8x16xf32> -> vector<2x8x16xf32>
    "tpu.trace_stop"() : () -> ()
    %23 = vector.shape_cast %22 : vector<2x8x16xf32> to vector<16x16xf32>
    %c0_16 = arith.constant 0 : index
    %c0_17 = arith.constant 0 : index
    %24 = vector.load %arg6[%c0_16, %c0_17] : memref<16x16xbf16, #tpu.memory_space<vmem>>, vector<16x16xbf16>
    %cst_18 = arith.constant dense<0.000000e+00> : vector<16x16xf32>
    %25 = tpu.matmul %1, %24, %cst_18 {dimension_numbers = #tpu.dot_dimension_numbers<[1], [0], [0], [1], [0, 0, 1, 1], [], []>} : vector<16x16xbf16>, vector<16x16xbf16>, vector<16x16xf32> -> vector<16x16xf32>
    %26 = arith.truncf %23 : vector<16x16xf32> to vector<16x16xbf16>
    %c0_19 = arith.constant 0 : index
    %c0_20 = arith.constant 0 : index
    %27 = vector.load %arg7[%c0_19, %c0_20] : memref<16x16xbf16, #tpu.memory_space<vmem>>, vector<16x16xbf16>
    %cst_21 = arith.constant dense<0.000000e+00> : vector<16x16xf32>
    %28 = tpu.matmul %26, %27, %cst_21 {dimension_numbers = #tpu.dot_dimension_numbers<[1], [0], [0], [1], [0, 0, 1, 1], [], []>} : vector<16x16xbf16>, vector<16x16xbf16>, vector<16x16xf32> -> vector<16x16xf32>
    %29 = arith.addf %25, %28 : vector<16x16xf32>
    %c0_22 = arith.constant 0 : index
    %c0_23 = arith.constant 0 : index
    %30 = vector.load %arg8[%c0_22, %c0_23] : memref<1x16xf32, #tpu.memory_space<vmem>>, vector<1x16xf32>
    %31 = vector.broadcast %30 : vector<1x16xf32> to vector<16x16xf32>
    %32 = arith.addf %29, %31 : vector<16x16xf32>
    %c0_24 = arith.constant 0 : index
    %c0_25 = arith.constant 0 : index
    %33 = vector.load %arg9[%c0_24, %c0_25] : memref<1x16xf32, #tpu.memory_space<vmem>>, vector<1x16xf32>
    %cst_26 = arith.constant 0.000000e+00 : f32
    %34 = vector.broadcast %cst_26 : f32 to vector<16x16xf32>
    %35 = arith.cmpf oge, %32, %34 : vector<16x16xf32>
    %36 = vector.broadcast %33 : vector<1x16xf32> to vector<16x16xf32>
    %37 = arith.mulf %36, %32 : vector<16x16xf32>
    %38 = arith.select %35, %32, %37 : vector<16x16xi1>, vector<16x16xf32>
    %c0_27 = arith.constant 0 : index
    %c0_28 = arith.constant 0 : index
    %39 = vector.load %arg10[%c0_27, %c0_28] : memref<16x16xf32, #tpu.memory_space<vmem>>, vector<16x16xf32>
    tpu.vector_store %arg10[%c0_27, %c0_28], %38 {strides = array<i32>} : memref<16x16xf32, #tpu.memory_space<vmem>>, vector<16x16xf32>,
    return
  }
}

</mosaic_0001>

<bundles_post_ra>
// kernel: attention_forward_fused.1
= control target key start
LH: loop header
LB: loop body
LE: loop exit
PB: predicated region body
PF: predicated region fallthrough
CT: control target
= control target key end

     0   :  { %vm85_vm0 = vcmask 130048   ;;  %s920_s3 = inlined_call_operand.vmem [shape: bf16[256,128], index: 3, kind: input, shape index: {}]   ;;  %s921_s4 = inlined_call_operand.vmem [shape: bf16[16,128], index: 4, kind: input, shape index: {}]   ;;  %s922_s1 = inlined_call_operand.vmem [shape: bf16[16,16], index: 1, kind: input, shape index: {}]   ;;  %s923_s0 = inlined_call_operand.vmem [shape: bf16[16,256], index: 0, kind: input, shape index: {}]   ;;  %s924_s5 = inlined_call_operand.vmem [shape: f32[1,128], index: 5, kind: input, shape index: {}]   ;;  %s925_s2 = inlined_call_operand.vmem [shape: bf16[2,128,16], index: 2, kind: input, shape index: {}]   ;;  %s926_s6 = inlined_call_operand.vmem [shape: bf16[16,16], index: 6, kind: input, shape index: {}]   ;;  %s927_s7 = inlined_call_operand.vmem [shape: bf16[16,16], index: 7, kind: input, shape index: {}]   ;;  %s928_s8 = inlined_call_operand.vmem [shape: f32[1,16], index: 8, kind: input, shape index: {}]   ;;  %s929_s9 = inlined_call_operand.vmem [shape: f32[1,16], index: 9, kind: input, shape index: {}]   ;;  %s930_s10 = inlined_call_operand.vmem [shape: f32[16,16], index: 10, kind: output, shape index: {}]  }
   0x1   :  { %v678_v0 = vld [vmem:[%s920_s3 + $0x38] sm:$0xff]  ;;  %v677_v2 = vld [vmem:[%s920_s3 + $0x30] sm:$0xff]  ;;  %v687_v4 = vld [vmem:[%s921_s4] sm:$0xff] }
   0x2   :  { %v686_v1 = vld [vmem:[%s920_s3 + $0x78] sm:$0xff]  ;;  %209 = vmatpush.bf16.msra.mxu1 %v678_v0  ;;  %v685_v3 = vld [vmem:[%s920_s3 + $0x70] sm:$0xff]  ;;  %v676_v5 = vld [vmem:[%s920_s3 + $0x28] sm:$0xff]  ;;  %96 = vmatpush.bf16.msra.mxu0 %v687_v4 }
   0x3   :  { %223 = vmatpush.bf16.msra.mxu2 %v686_v1  ;;  %v684_v6 = vld [vmem:[%s920_s3 + $0x68] sm:$0xff]  ;;  %v796_v7 = vld [vmem:[%s922_s1] sm:$0xff]  ;;  %v674_v10 = vld [vmem:[%s920_s3 + $0x18] sm:$0xff] }
   0x4   :  { %v675_v8 = vld [vmem:[%s920_s3 + $0x20] sm:$0xff]  ;;  %v682_v11 = vld [vmem:[%s920_s3 + $0x58] sm:$0xff]  ;;  %v673_v12 = vld [vmem:[%s920_s3 + $0x10] sm:$0xff] }
   0x5   :  { %v683_v9 = vld [vmem:[%s920_s3 + $0x60] sm:$0xff]  ;;  %521 = vmatmul.msk.bf16.vlgmr.msra.gmra.mxu0 %vm85_vm0, %v796_v7  ;;  %v681_v13 = vld [vmem:[%s920_s3 + $0x50] sm:$0xff]  ;;  %v672_v14 = vld [vmem:[%s920_s3 + $0x8] sm:$0xff] }
   0x6   :  { %210 = vmatpush.bf16.msra.mxu1 %v677_v2  ;;  %v680_v15 = vld [vmem:[%s920_s3 + $0x48] sm:$0xff]  ;;  %v671_v16 = vld [vmem:[%s920_s3] sm:$0xff]  ;;  %v695_v37 = vld [vmem:[%s925_s2 + $0x38] sm:$0xff] }
   0x7   :  { %224 = vmatpush.bf16.msra.mxu2 %v685_v3  ;;  %v679_v17 = vld [vmem:[%s920_s3 + $0x40] sm:$0xff]  ;;  %v669_v19 = vld [vmem:[%s923_s0 + $0x4] sm:$0xf0]  ;;  %v526_v21 = vld [vmem:[%s923_s0 + $0x8] sm:$0xf0]  ;;  %369 = vmatpush.bf16.msra.mxu3 %v695_v37 }
   0x8   :  { %v524_v18 = vld [vmem:[%s923_s0] sm:$0xf]  ;;  %v668_v20 = vld [vmem:[%s923_s0 + $0x4] sm:$0xf]  ;;  %v703_v38 = vld [vmem:[%s925_s2 + $0x78] sm:$0xff] }
   0x9   :  { %v525_v22 = vor.u32 %v669_v19, %v524_v18  ;;  %v529_v23 = vor.u32 %v668_v20, %v526_v21  ;;  %v706_v27 = vld [vmem:[%s924_s5] ss:$0 sm:$0xff]  ;;  %v694_v39 = vld [vmem:[%s925_s2 + $0x30] sm:$0xff]  ;;  %430 = vmatpush.bf16.msrb.mxu0 %v703_v38  ;;  %v693_v40 = vld [vmem:[%s925_s2 + $0x28] sm:$0xff] }
   0xa   :  { %211 = vmatpush.bf16.msra.mxu1 %v676_v5  ;;  %v692_v49 = vld [vmem:[%s925_s2 + $0x20] sm:$0xff]  ;;  %v702_v50 = vld [vmem:[%s925_s2 + $0x70] sm:$0xff]  ;;  %v691_v51 = vld [vmem:[%s925_s2 + $0x18] sm:$0xff] }
   0xb   :  { %225 = vmatpush.bf16.msra.mxu2 %v684_v6  ;;  %370 = vmatpush.bf16.msra.mxu3 %v694_v39  ;;  %v701_v52 = vld [vmem:[%s925_s2 + $0x68] sm:$0xff]  ;;  %v690_v53 = vld [vmem:[%s925_s2 + $0x10] sm:$0xff]  ;;  %v700_v54 = vld [vmem:[%s925_s2 + $0x60] sm:$0xff] }
   0xc   :  { %v689_v55 = vld [vmem:[%s925_s2 + $0x8] sm:$0xff]  ;;  %v699_v56 = vld [vmem:[%s925_s2 + $0x58] sm:$0xff]  ;;  %v688_v57 = vld [vmem:[%s925_s2] sm:$0xff] }
   0xd   :  { %431 = vmatpush.bf16.msrb.mxu0 %v702_v50  ;;  %v698_v58 = vld [vmem:[%s925_s2 + $0x50] sm:$0xff]  ;;  %v697_v59 = vld [vmem:[%s925_s2 + $0x48] sm:$0xff]  ;;  %v696_v60 = vld [vmem:[%s925_s2 + $0x40] sm:$0xff] }
   0xe   :  { %212 = vmatpush.bf16.msra.mxu1 %v675_v8  ;;  %v704_v61 = vld [vmem:[%s926_s6] sm:$0xff] }
   0xf   :  { %226 = vmatpush.bf16.msra.mxu2 %v683_v9  ;;  %371 = vmatpush.bf16.msra.mxu3 %v693_v40  ;;  %v705_v62 = vld [vmem:[%s927_s7] sm:$0xff] }
  0x11   :  { %432 = vmatpush.bf16.msrb.mxu0 %v701_v52 }
  0x12   :  { %213 = vmatpush.bf16.msra.mxu1 %v674_v10 }
  0x13   :  { %227 = vmatpush.bf16.msra.mxu2 %v682_v11  ;;  %372 = vmatpush.bf16.msra.mxu3 %v692_v49 }
  0x15   :  { %433 = vmatpush.bf16.msrb.mxu0 %v700_v54 }
  0x16   :  { %214 = vmatpush.bf16.msra.mxu1 %v673_v12 }
  0x17   :  { %228 = vmatpush.bf16.msra.mxu2 %v681_v13  ;;  %373 = vmatpush.bf16.msra.mxu3 %v691_v51 }
  0x19   :  { %434 = vmatpush.bf16.msrb.mxu0 %v699_v56 }
  0x1a   :  { %215 = vmatpush.bf16.msra.mxu1 %v672_v14 }
  0x1b   :  { %229 = vmatpush.bf16.msra.mxu2 %v680_v15  ;;  %374 = vmatpush.bf16.msra.mxu3 %v690_v53 }
  0x1d   :  { %435 = vmatpush.bf16.msrb.mxu0 %v698_v58 }
  0x1e   :  { %216 = vmatpush.bf16.msra.mxu1 %v671_v16 }
  0x1f   :  { %230 = vmatpush.bf16.msra.mxu2 %v679_v17  ;;  %375 = vmatpush.bf16.msra.mxu3 %v689_v55 }
  0x21   :  { %217 = vmatmul.bf16.vlgmr.msra.gmra.mxu1 %v525_v22  ;;  %436 = vmatpush.bf16.msrb.mxu0 %v697_v59 }
  0x22   :  { %231 = vmatmul.bf16.vlgmr.msra.gmra.mxu2 %v529_v23  ;;  %464 = vmatpush.bf16.msrb.mxu1 %v705_v62 }
  0x23   :  { %376 = vmatpush.bf16.msra.mxu3 %v688_v57  ;;  %484 = vmatpush.bf16.msrb.mxu2 %v704_v61 }
  0x25   :  { %437 = vmatpush.bf16.msrb.mxu0 %v696_v60 }
  0x32   :  { %667 = vmatmul.msk.bf16.vlgmr.msrb.gmra.mxu2 %vm85_vm0, %v796_v7 }
  0x82   :  { %v98_v25 = vpop.f32.mrf.mxu0 }
  0x8a   :  { %v100_v32 = vpop.f32.mrf.mxu0 }
  0x9e   :  { %v218_v24 = vpop.f32.mrf.mxu1 }
  0x9f   :  { %v219_v26 = vadd.f32 %v218_v24, %v98_v25 }
  0xa5   :  { %v232_v28 = vpop.f32.mrf.mxu2 }
  0xa6   :  { %v233_v29 = vadd.f32 %v232_v28, %v219_v26  ;;  %v220_v31 = vpop.f32.mrf.mxu1 }
  0xa7   :  { %v221_v33 = vadd.f32 %v220_v31, %v100_v32  ;;  %v707_v31 = vld [vmem:[%s928_s8] ss:$0 sm:$0xff] }
  0xa8   :  { %v241_v30 = vadd.f32 %v706_v27, %v233_v29 }
  0xaa   :  { %243 = vmax.xlane.f32.xlu0 %v241_v30 }
  0xad   :  { %v234_v34 = vpop.f32.mrf.mxu2 }
  0xae   :  { %v235_v35 = vadd.f32 %v234_v34, %v221_v33  ;;  %v708_v34 = vld [vmem:[%s929_s9] ss:$0 sm:$0xff] }
  0xb0   :  { %v242_v36 = vadd.f32 %v706_v27, %v235_v35 }
  0xb2   :  { %245 = vmax.xlane.f32.xlu0 %v242_v36 }
 0x11d   :  { %v244_v41 = vpop.xlane.xlu0 %243 }
 0x11e   :  { %v247_v42 = vsub.f32 %v241_v30, %v244_v41  ;;  %v486_v30 = vpop.f32.mrf.mxu2 }
 0x120   :  { %v249_v43 = vmul.f32 1.442695, %v247_v42 }
 0x122   :  { %709 = vpow2.f32 %v249_v43 }
 0x125   :  { %v246_v44 = vpop.xlane.xlu0 %245 }
 0x126   :  { %v248_v45 = vsub.f32 %v242_v36, %v246_v44  ;;  %v488_v38 = vpop.f32.mrf.mxu2 }
 0x128   :  { %v710_v46 = vpop.eup %709  ;;  %v251_v47 = vmul.f32 1.442695, %v248_v45 }
 0x129   :  { %253 = vadd.xlane.f32.xlu1 %v710_v46 }
 0x12a   :  { %711 = vpow2.f32 %v251_v47 }
 0x130   :  { %v857_v48 = vpop.eup %711 }
 0x131   :  { %255 = vadd.xlane.f32.xlu1 %v857_v48 }
 0x19c   :  { %v254_v63 = vpop.xlane.xlu1 %253 }
 0x19d   :  { %713 = vrcp.f32 %v254_v63  ;;  %v268_v4 = vand.u32 2147483648, %v254_v63  ;;  %v266_v6 = vand.u32 2147483647, %v254_v63  ;;  %vm262_vm2 = vweird.f32 %v254_v63 }
 0x19f   :  { %v269_v10 = vor.u32 1.1754944e-38, %v268_v4  ;;  %vm267_vm4 = vcmp.eq.f32.partialorder %v266_v6, 8.507059e+37 }
 0x1a3   :  { %v714_v0 = vpop.eup %713 }
 0x1a4   :  { %v258_v1 = vmul.f32 %v714_v0, %v254_v63  ;;  %v256_v2 = vpop.xlane.xlu1 %255  ;;  %vm263_vm1 = vweird.f32 %v714_v0 }
 0x1a5   :  { %715 = vrcp.f32 %v256_v2  ;;  %vm264_vm3 = vmor %vm262_vm2, %vm263_vm1  ;;  %v283_v15 = vand.u32 2147483648, %v256_v2  ;;  %v281_v17 = vand.u32 2147483647, %v256_v2  ;;  %vm277_vm6 = vweird.f32 %v256_v2 }
 0x1a6   :  { %v259_v3 = vsub.f32 1.0, %v258_v1 }
 0x1a7   :  { %v284_v20 = vor.u32 1.1754944e-38, %v283_v15  ;;  %vm282_vm8 = vcmp.eq.f32.partialorder %v281_v17, 8.507059e+37 }
 0x1a8   :  { %v260_v5 = vmul.f32 %v714_v0, %v259_v3 }
 0x1aa   :  { %v261_v8 = vadd.f32 %v714_v0, %v260_v5 }
 0x1ab   :  { %v716_v9 = vpop.eup %715 }
 0x1ac   :  { %v273_v11 = vmul.f32 %v716_v9, %v256_v2  ;;  %v265_v12 = vsel %vm264_vm3, %v714_v0, %v261_v8  ;;  %vm278_vm5 = vweird.f32 %v716_v9 }
 0x1ad   :  { %v270_v13 = vsel %vm267_vm4, %v269_v10, %v265_v12  ;;  %vm279_vm7 = vmor %vm277_vm6, %vm278_vm5 }
 0x1ae   :  { %v274_v14 = vsub.f32 1.0, %v273_v11  ;;  %v271_v7 = vmul.f32 %v710_v46, %v270_v13 }
 0x1b0   :  { %v275_v16 = vmul.f32 %v716_v9, %v274_v14  ;;  %v287_v18 = vpack.c.bf16 %v271_v7, %v271_v7 }
 0x1b2   :  { %v276_v19 = vadd.f32 %v716_v9, %v275_v16  ;;  %377 = vmatmul.bf16.vlgmr.msra.gmra.mxu3 %v287_v18 }
 0x1b4   :  { %v280_v21 = vsel %vm279_vm7, %v716_v9, %v276_v19 }
 0x1b5   :  { %v285_v22 = vsel %vm282_vm8, %v284_v20, %v280_v21 }
 0x1b6   :  { %v286_v23 = vmul.f32 %v857_v48, %v285_v22 }
 0x1b8   :  { %v288_v24 = vpack.c.bf16 %v286_v23, %v286_v23 }
 0x1ba   :  { %438 = vmatmul.bf16.vlgmr.msrb.gmra.mxu0 %v288_v24 }
 0x235   :  { %v378_v25 = vpop.f32.mrf.mxu3 }
 0x237   :  { %v439_v26 = vpop.f32.mrf.mxu0 }
 0x238   :  { %v445_v27 = vpack.c.bf16 %v439_v26, %v378_v25 }
 0x23a   :  { %662 = vmatmul.msk.bf16.vlgmr.msrb.gmra.mxu1 %vm85_vm0, %v445_v27 }
 0x23d   :  { %v380_v28 = vpop.f32.mrf.mxu3 }
 0x23f   :  { %v441_v29 = vpop.f32.mrf.mxu0 }
 0x2b7   :  { %v466_v32 = vpop.f32.mrf.mxu1 }
 0x2b8   :  { %v487_v33 = vadd.f32 %v486_v30, %v466_v32 }
 0x2ba   :  { %v495_v35 = vadd.f32 %v707_v31, %v487_v33 }
 0x2bc   :  { %vm498_vm9 = vcmp.ge.f32.partialorder %v495_v35, 0.0  ;;  %v503_v36 = vmul.f32 %v708_v34, %v495_v35 }
 0x2be   :  { %v505_v37 = vsel %vm498_vm9, %v495_v35, %v503_v36 }
 0x2bf   :  { %507 = vst.msk [vmem:[%s930_s10] sm:$0xff] %vm85_vm0, %v505_v37  ;;  %v468_v39 = vpop.f32.mrf.mxu1 }
 0x2c0   :  { %v489_v40 = vadd.f32 %v488_v38, %v468_v39 }
 0x2c2   :  { %v496_v41 = vadd.f32 %v707_v31, %v489_v40 }
 0x2c4   :  { %vm499_vm10 = vcmp.ge.f32.partialorder %v496_v41, 0.0  ;;  %v504_v42 = vmul.f32 %v708_v34, %v496_v41 }
 0x2c6   :  { %v506_v43 = vsel %vm499_vm10, %v496_v41, %v504_v42 }
 0x2c7   :  { %508 = vst.msk [vmem:[%s930_s10 + $0x8] sm:$0xff] %vm85_vm0, %v506_v43 }

</bundles_post_ra>
